<compile_context>
chip_gen: v7x
topology: tpu7x:2x2x1
jax: 0.10.0
libtpu: 0.0.40
codegen_flags: <defaults>
</compile_context>

<pallas_src>
import functools

import jax
import jax.numpy as jnp
from jax.experimental import pallas as pl
from jax.experimental.pallas import tpu as pltpu


def _round_up(x, m):
    return (x + m - 1) // m * m


# ----------------------------------------------------------------------------
# Kernel: prob = sigmoid(logits_rows) @ positive_map.T   (row-tiled, lane-dense)
# ----------------------------------------------------------------------------
def _sigmoid_matmul_kernel(logits_ref, posmap_t_ref, prob_ref, *, matmul_dtype):
    # logits_ref: [rt, Tp] block, posmap_t_ref: [Tp, Cp] (stationary),
    # prob_ref: [rt, Cp] block.
    x = logits_ref[...].astype(jnp.float32)
    p = jax.nn.sigmoid(x)                              # f32 sigmoid (EUP/VPU)
    prob_ref[...] = jnp.dot(
        p.astype(matmul_dtype),                        # bf16 through the MXU
        posmap_t_ref[...].astype(matmul_dtype),
        preferred_element_type=jnp.float32,            # f32 accumulation
    )


def sigmoid_matmul(out_logits, positive_map, *, row_tile=256,
                   matmul_dtype=jnp.bfloat16):
    """sigmoid(out_logits) @ positive_map.T as one padded, row-tiled matmul."""
    B, Q, T = out_logits.shape
    C, T2 = positive_map.shape
    assert T2 == T, "positive_map token dim must match pred_logits token dim"

    rows = B * Q
    Tp = _round_up(T, 128)                             # lane-aligned contraction
    Cp = _round_up(C, 128)                             # lane-dense output
    rt = min(row_tile, _round_up(rows, 8))             # sublane-aligned row tile
    rows_pad = _round_up(rows, rt)

    logits2d = out_logits.reshape(rows, T)
    logits2d = jnp.pad(logits2d, ((0, rows_pad - rows), (0, Tp - T)))
    # Zero-padded token rows / category cols contribute exactly 0 to the dot.
    pm_t = jnp.pad(positive_map.T.astype(jnp.float32),
                   ((0, Tp - T), (0, Cp - C)))

    grid = (rows_pad // rt,)
    cost = pl.CostEstimate(
        flops=2 * rows_pad * Tp * Cp,
        transcendentals=rows_pad * Tp,
        bytes_accessed=4 * (rows_pad * Tp + Tp * Cp + rows_pad * Cp),
    )

    # TODO(synk): for very large T (real detection configs), add a trailing
    # "arbitrary" T-reduction grid axis with a VMEM f32 accumulator so the
    # [rt, Tp] / [Tp, Cp] blocks stay within scoped VMEM (32 MiB on v7x).
    prob_pad = pl.pallas_call(
        functools.partial(_sigmoid_matmul_kernel, matmul_dtype=matmul_dtype),
        out_shape=jax.ShapeDtypeStruct((rows_pad, Cp), jnp.float32),
        grid=grid,
        in_specs=[
            pl.BlockSpec((rt, Tp), lambda i: (i, 0)),
            pl.BlockSpec((Tp, Cp), lambda i: (0, 0)),  # stationary, DMA'd once
        ],
        out_specs=pl.BlockSpec((rt, Cp), lambda i: (i, 0)),
        compiler_params=pltpu.CompilerParams(
            dimension_semantics=("parallel",)),        # megacore-friendly on v7x
        cost_estimate=cost,
    )(logits2d, pm_t)

    # Padded categories score exactly 0; slice them off BEFORE reshape + top_k.
    return prob_pad[:rows, :C].reshape(B, Q, C)


# ----------------------------------------------------------------------------
# Plain-JAX helpers (too small for a kernel; XLA fuses these)
# ----------------------------------------------------------------------------
def _cxcywh_to_xyxy(b):
    cx, cy, w, h = jnp.split(b, 4, axis=-1)
    return jnp.concatenate(
        [cx - 0.5 * w, cy - 0.5 * h, cx + 0.5 * w, cy + 0.5 * h], axis=-1)


# ----------------------------------------------------------------------------
# Full forward pass (mirrors PostProcessSeginw.forward)
# ----------------------------------------------------------------------------
def post_process_seginw(outputs, target_sizes, positive_map, num_select,
                        not_to_xyxy=False, matmul_dtype=jnp.bfloat16):
    out_logits = outputs["pred_logits"]                # [B, Q, T]
    out_bbox = outputs["pred_boxes"]                   # [B, Q, 4]
    B, Q, T = out_logits.shape
    C = positive_map.shape[0]
    assert positive_map.shape[1] == T
    assert out_logits.shape[0] == target_sizes.shape[0]
    assert target_sizes.shape[1] == 2

    # --- Pallas kernel: sigmoid + projection onto category positive map ---
    prob = sigmoid_matmul(out_logits, positive_map,
                          matmul_dtype=matmul_dtype)   # [B, Q, C]

    # --- top-k over flattened (query, category) axis ---
    # TODO(synk): top-k / sort has no clean Pallas TPU equivalent; jax.lax.top_k.
    flat = prob.reshape(B, Q * C)
    topk_values, topk_indexes = jax.lax.top_k(flat, num_select)
    scores = topk_values
    topk_boxes = topk_indexes // C                     # which query
    labels = topk_indexes % C                          # which category

    # gather selected boxes, convert cxcywh -> xyxy, scale by [w, h, w, h]
    gathered = jnp.take_along_axis(out_bbox, topk_boxes[..., None], axis=1)
    boxes = gathered if not_to_xyxy else _cxcywh_to_xyxy(gathered)

    img_h = target_sizes[:, 0].astype(jnp.float32)
    img_w = target_sizes[:, 1].astype(jnp.float32)
    scale_fct = jnp.stack([img_w, img_h, img_w, img_h], axis=1)  # [B, 4]
    boxes = boxes * scale_fct[:, None, :]

    results = [{"scores": s, "labels": l, "boxes": b}
               for s, l, b in zip(scores, labels, boxes)]
    return results, (scores, labels, boxes)


# ----------------------------------------------------------------------------
# Pure-JAX reference for verification
# ----------------------------------------------------------------------------
def reference(out_logits, out_bbox, target_sizes, positive_map, num_select,
              matmul_dtype=None):
    p = jax.nn.sigmoid(out_logits.astype(jnp.float32))
    pm_t = positive_map.T.astype(jnp.float32)
    if matmul_dtype is not None:
        p = p.astype(matmul_dtype)
        pm_t = pm_t.astype(matmul_dtype)
    prob = jnp.einsum("bqt,tc->bqc", p, pm_t,
                      preferred_element_type=jnp.float32)
    B, Q, C = prob.shape
    tv, ti = jax.lax.top_k(prob.reshape(B, -1), num_select)
    tb = ti // C
    labels = ti % C
    gathered = jnp.take_along_axis(out_bbox, tb[..., None], axis=1)
    boxes = _cxcywh_to_xyxy(gathered)
    img_h = target_sizes[:, 0].astype(jnp.float32)
    img_w = target_sizes[:, 1].astype(jnp.float32)
    scale = jnp.stack([img_w, img_h, img_w, img_h], axis=1)
    boxes = boxes * scale[:, None, :]
    return tv, labels, boxes


if __name__ == "__main__":
    # Small synthetic shapes consistent with the module's forward.
    B, Q, T, C = 2, 16, 32, 8        # batch, queries, token dim, categories
    NUM_SELECT = 8

    key = jax.random.PRNGKey(0)
    k1, k2, k3 = jax.random.split(key, 3)

    pred_logits = jax.random.normal(k1, (B, Q, T), dtype=jnp.float32)
    pred_boxes = jax.random.uniform(k2, (B, Q, 4), dtype=jnp.float32,
                                    minval=0.05, maxval=0.95)
    # Deterministic synthetic positive_map (normally built from COCO categories
    # + tokenizer in __init__; that host-side setup has no Pallas equivalent).
    positive_map = jax.random.uniform(k3, (C, T), dtype=jnp.float32)
    positive_map = positive_map / jnp.sum(positive_map, axis=1, keepdims=True)

    target_sizes = jnp.array([[480, 640], [512, 384]], dtype=jnp.int32)  # (h, w)

    outputs = {"pred_logits": pred_logits, "pred_boxes": pred_boxes}

    results, (scores, labels, boxes) = post_process_seginw(
        outputs, target_sizes, positive_map, NUM_SELECT)
    jax.block_until_ready((scores, labels, boxes))

    # Reference with matched (bf16-operand) matmul precision -> exact ranking.
    m_scores, m_labels, m_boxes = reference(
        pred_logits, pred_boxes, target_sizes, positive_map, NUM_SELECT,
        matmul_dtype=jnp.bfloat16)
    # Full-f32 reference -> scores agree to bf16 quantization error.
    f_scores, _, _ = reference(
        pred_logits, pred_boxes, target_sizes, positive_map, NUM_SELECT)

    assert scores.shape == (B, NUM_SELECT)
    assert labels.shape == (B, NUM_SELECT)
    assert boxes.shape == (B, NUM_SELECT, 4)
    assert jnp.allclose(scores, m_scores, atol=1e-5, rtol=1e-5)
    assert jnp.array_equal(labels, m_labels)
    assert jnp.allclose(boxes, m_boxes, atol=1e-4, rtol=1e-5)
    assert jnp.allclose(scores, f_scores, atol=2e-2, rtol=2e-2)

    print("KERNEL_OK")
</pallas_src>

<mosaic_0001>
module attributes {stable_mosaic.version = 11 : i64} {
  func.func @_sigmoid_matmul_kernel(%arg0: i32, %arg1: memref<32x128xf32, #tpu.memory_space<vmem>>, %arg2: memref<128x128xf32, #tpu.memory_space<vmem>>, %arg3: memref<32x128xf32, #tpu.memory_space<vmem>>) attributes {dimension_semantics = [#tpu.dimension_semantics<parallel>], iteration_bounds = array<i64: 1>, scalar_prefetch = 0 : i64, scratch_operands = 0 : i64, tpu.core_type = #tpu.core_type<tc>, window_params = [{transform_indices = @transform_0, window_bounds = array<i64: 32, 128>}, {pipeline_mode = #tpu.pipeline_mode<synchronous>, transform_indices = @transform_1, window_bounds = array<i64: 128, 128>}, {transform_indices = @transform_2, window_bounds = array<i64: 32, 128>}]} {
    %c0 = arith.constant 0 : index
    %c0_0 = arith.constant 0 : index
    %0 = vector.load %arg1[%c0, %c0_0] : memref<32x128xf32, #tpu.memory_space<vmem>>, vector<32x128xf32>
    %1 = arith.negf %0 : vector<32x128xf32>
    %2 = math.exp %1 : vector<32x128xf32>
    %cst = arith.constant 1.000000e+00 : f32
    %3 = vector.broadcast %cst : f32 to vector<32x128xf32>
    %4 = arith.addf %3, %2 : vector<32x128xf32>
    %5 = arith.divf %3, %4 : vector<32x128xf32>
    %6 = arith.truncf %5 : vector<32x128xf32> to vector<32x128xbf16>
    %c0_1 = arith.constant 0 : index
    %c0_2 = arith.constant 0 : index
    %7 = vector.load %arg2[%c0_1, %c0_2] : memref<128x128xf32, #tpu.memory_space<vmem>>, vector<128x128xf32>
    %8 = arith.truncf %7 : vector<128x128xf32> to vector<128x128xbf16>
    %cst_3 = arith.constant dense<0.000000e+00> : vector<32x128xf32>
    %9 = tpu.matmul %6, %8, %cst_3 {dimension_numbers = #tpu.dot_dimension_numbers<[1], [0], [0], [1], [0, 0, 1, 1], [], []>} : vector<32x128xbf16>, vector<128x128xbf16>, vector<32x128xf32> -> vector<32x128xf32>
    %c0_4 = arith.constant 0 : index
    %c0_5 = arith.constant 0 : index
    %10 = vector.load %arg3[%c0_4, %c0_5] : memref<32x128xf32, #tpu.memory_space<vmem>>, vector<32x128xf32>
    tpu.vector_store %arg3[%c0_4, %c0_5], %9 {strides = array<i32>} : memref<32x128xf32, #tpu.memory_space<vmem>>, vector<32x128xf32>,
    return
  }
  func.func @transform_0(%arg0: i32) -> (i32, i32) {
    %c0_i32 = arith.constant 0 : i32
    %c0_i32_0 = arith.constant 0 : i32
    return %arg0, %c0_i32 : i32, i32
  }
  func.func @transform_1(%arg0: i32) -> (i32, i32) {
    %c0_i32 = arith.constant 0 : i32
    %c0_i32_0 = arith.constant 0 : i32
    %c0_i32_1 = arith.constant 0 : i32
    return %c0_i32, %c0_i32_0 : i32, i32
  }
  func.func @transform_2(%arg0: i32) -> (i32, i32) {
    %c0_i32 = arith.constant 0 : i32
    %c0_i32_0 = arith.constant 0 : i32
    return %arg0, %c0_i32 : i32, i32
  }
}

</mosaic_0001>

<bundles_post_ra>
// kernel: tpu_custom_call.1
= control target key start
LH: loop header
LB: loop body
LE: loop exit
PB: predicated region body
PF: predicated region fallthrough
CT: control target
= control target key end

     0   :  { %7 = vsyncpa [#allocation3], 0  ;;  %s358_s0 = inlined_call_operand.hbm [shape: f32[32,128], index: 0, kind: input, shape index: {}]   ;;  %s359_s1 = inlined_call_operand.hbm [shape: f32[128,128], index: 1, kind: input, shape index: {}]   ;;  %s360_s2 = inlined_call_operand.hbm [shape: f32[32,128], index: 2, kind: output, shape index: {}]  }
   0x1   :  { %8 = vsyncpa [#allocation6], 0 }
   0x2   :  { %9 = vsyncpa [#allocation4], 0  ;;  %s293_s9 = smov [#allocation2]   ;;  %s221_s13 = scalar_lea.hbm %s358_s0, 512 }
   0x3   :  { %s15_s10 = sshll.u32 %s293_s9, 4  ;;  %p222_p0 = scmp.ne.s32.totalorder %s358_s0, %s221_s13  ;;  %s16_s10 = int_to_ptr.vmem [resolvable:$true] %s15_s10 }
   0x4   :  { %p225_p1 = scmp.lt.u32.totalorder %s221_s13, %s358_s0 }
   0x6   :  { %p227_p2 = pnand %p225_p1, %p222_p0 }
   0x8   :  { %230 = shalt.err (!%p227_p2)
}
   0x9   :  { %s231_s18 = scalar_lea.vmem %s16_s10, 512  ;;  %p236_p4 = scmp.lt.s32.totalorder %s16_s10, %s16_s10 }
   0xa   :  { %p232_p3 = scmp.ne.s32.totalorder %s16_s10, %s231_s18  ;;  %p237_p5 = scmp.lt.s32.totalorder %s231_s18, %s231_s18 }
   0xc   :  { %p238_p6 = por %p237_p5, %p236_p4 }
   0xe   :  { %p239_p7 = pnand %p238_p6, %p232_p3 }
  0x10   :  { %242 = shalt.err (!%p239_p7)
}
  0x11   :  { %s294_s19 = smov 128   ;;  %s295_s20 = smov 8  }
  0x12   :  { %21 = dma.hbm_to_vmem [thread:$0]  %s358_s0, 512, %s16_s10, [#allocation3], %s294_s19, %s294_s19, %s295_s20  }
  0x13   :  { %s296_s23 = smov [#allocation5]   ;;  %s243_s27 = scalar_lea.hbm %s359_s1, 2048 }
  0x14   :  { %s27_s24 = sshll.u32 %s296_s23, 4  ;;  %p244_p8 = scmp.ne.s32.totalorder %s359_s1, %s243_s27  ;;  %s28_s24 = int_to_ptr.vmem [resolvable:$true] %s27_s24 }
  0x15   :  { %p247_p9 = scmp.lt.u32.totalorder %s243_s27, %s359_s1 }
  0x17   :  { %p249_p10 = pnand %p247_p9, %p244_p8 }
  0x19   :  { %252 = shalt.err (!%p249_p10)
}
  0x1a   :  { %s253_s4 = scalar_lea.vmem %s28_s24, 2048  ;;  %p258_p12 = scmp.lt.s32.totalorder %s28_s24, %s28_s24 }
  0x1b   :  { %p254_p11 = scmp.ne.s32.totalorder %s28_s24, %s253_s4  ;;  %p259_p13 = scmp.lt.s32.totalorder %s253_s4, %s253_s4 }
  0x1d   :  { %p260_p0 = por %p259_p13, %p258_p12 }
  0x1f   :  { %p261_p1 = pnand %p260_p0, %p254_p11 }
  0x21   :  { %264 = shalt.err (!%p261_p1)
}
  0x22   :  { %33 = dma.hbm_to_vmem [thread:$0]  %s359_s1, 2048, %s28_s24, [#allocation6], %s294_s19, %s294_s19, %s295_s20  }
  0x23   :  { %287 = dma.done.wait [#allocation3], 512  }
  0x24   :  { %288 = vsyncadd [#allocation3], 4294966784 }
  0x25   :  { %289 = dma.done.wait [#allocation6], 2048  }
  0x26   :  { %290 = vsyncadd [#allocation6], 4294965248  ;;  %v71_v0 = vld [vmem:[#allocation5] sm:$0xff]  ;;  %v72_v1 = vld [vmem:[#allocation5 + $0x8] sm:$0xff]  ;;  %s297_s1 = smov [#allocation7]  }
  0x27   :  { %v73_v2 = vld [vmem:[#allocation5 + $0x10] sm:$0xff]  ;;  %v87_v3 = vpack.c.bf16 %v72_v1, %v71_v0  ;;  %v74_v4 = vld [vmem:[#allocation5 + $0x18] sm:$0xff]  ;;  %v75_v6 = vld [vmem:[#allocation5 + $0x20] sm:$0xff]  ;;  %s153_s6 = sshll.u32 %s297_s1, 4  ;;  %s154_s6 = int_to_ptr.vmem [resolvable:$true] %s153_s6 }
  0x28   :  { %v88_v5 = vpack.c.bf16 %v74_v4, %v73_v2  ;;  %v76_v7 = vld [vmem:[#allocation5 + $0x28] sm:$0xff]  ;;  %v77_v8 = vld [vmem:[#allocation5 + $0x30] sm:$0xff]  ;;  %v78_v10 = vld [vmem:[#allocation5 + $0x38] sm:$0xff]  ;;  %s265_s7 = scalar_lea.vmem %s154_s6, 512  ;;  %p270_p3 = scmp.lt.s32.totalorder %s154_s6, %s154_s6 }
  0x29   :  { %180 = vmatprep.subr.bf16.mxu0 %v87_v3  ;;  %v89_v9 = vpack.c.bf16 %v76_v7, %v75_v6  ;;  %v41_v11 = vld [vmem:[#allocation2] sm:$0xff]  ;;  %v42_v12 = vld [vmem:[#allocation2 + $0x8] sm:$0xff]  ;;  %v43_v15 = vld [vmem:[#allocation2 + $0x10] sm:$0xff]  ;;  %v90_v19 = vpack.c.bf16 %v78_v10, %v77_v8  ;;  %p266_p2 = scmp.ne.s32.totalorder %s154_s6, %s265_s7  ;;  %p271_p4 = scmp.lt.s32.totalorder %s265_s7, %s265_s7 }
  0x2a   :  { %181 = vmatpush3.bf16.msra.mxu0 %v87_v3  ;;  %v166_v13 = vmul.f32 -1.442695, %v41_v11  ;;  %v167_v14 = vmul.f32 -1.442695, %v42_v12  ;;  %v44_v16 = vld [vmem:[#allocation2 + $0x18] sm:$0xff]  ;;  %v79_v20 = vld [vmem:[#allocation5 + $0x40] sm:$0xff] }
  0x2b   :  { %182 = vmatprep.subr.bf16.mxu0 %v88_v5  ;;  %v168_v17 = vmul.f32 -1.442695, %v43_v15  ;;  %v169_v18 = vmul.f32 -1.442695, %v44_v16  ;;  %v80_v21 = vld [vmem:[#allocation5 + $0x48] sm:$0xff]  ;;  %v81_v23 = vld [vmem:[#allocation5 + $0x50] sm:$0xff]  ;;  %p272_p5 = por %p271_p4, %p270_p3 }
  0x2c   :  { %205 = vpow2.f32 %v166_v13  ;;  %v91_v22 = vpack.c.bf16 %v80_v21, %v79_v20  ;;  %v82_v24 = vld [vmem:[#allocation5 + $0x58] sm:$0xff]  ;;  %v83_v27 = vld [vmem:[#allocation5 + $0x60] sm:$0xff]  ;;  %v84_v28 = vld [vmem:[#allocation5 + $0x68] sm:$0xff] }
  0x2d   :  { %207 = vpow2.f32 %v167_v14  ;;  %v92_v25 = vpack.c.bf16 %v82_v24, %v81_v23  ;;  %v93_v34 = vpack.c.bf16 %v84_v28, %v83_v27  ;;  %v85_v36 = vld [vmem:[#allocation5 + $0x70] sm:$0xff]  ;;  %v86_v37 = vld [vmem:[#allocation5 + $0x78] sm:$0xff]  ;;  %p273_p6 = pnand %p272_p5, %p266_p2 }
  0x2e   :  { %183 = vmatpush3.bf16.msra.mxu0 %v88_v5  ;;  %209 = vpow2.f32 %v168_v17  ;;  %v94_v39 = vpack.c.bf16 %v86_v37, %v85_v36 }
  0x2f   :  { %184 = vmatprep.subr.bf16.mxu0 %v89_v9  ;;  %211 = vpow2.f32 %v169_v18 }
  0x32   :  { %185 = vmatpush3.bf16.msra.mxu0 %v89_v9 }
  0x33   :  { %186 = vmatprep.subr.bf16.mxu0 %v90_v19 }
  0x36   :  { %187 = vmatpush3.bf16.msra.mxu0 %v90_v19  ;;  %v206_v26 = vpop.eup %205 }
  0x37   :  { %188 = vmatprep.subr.bf16.mxu0 %v91_v22  ;;  %v208_v29 = vpop.eup %207  ;;  %v57_v30 = vadd.f32 1.0, %v206_v26 }
  0x38   :  { %v210_v31 = vpop.eup %209  ;;  %v58_v32 = vadd.f32 1.0, %v208_v29 }
  0x39   :  { %v212_v33 = vpop.eup %211  ;;  %213 = vrcp.f32 %v57_v30  ;;  %v59_v35 = vadd.f32 1.0, %v210_v31 }
  0x3a   :  { %189 = vmatpush3.bf16.msra.mxu0 %v91_v22  ;;  %215 = vrcp.f32 %v58_v32  ;;  %v60_v38 = vadd.f32 1.0, %v212_v33 }
  0x3b   :  { %190 = vmatprep.subr.bf16.mxu0 %v92_v25  ;;  %217 = vrcp.f32 %v59_v35 }
  0x3c   :  { %219 = vrcp.f32 %v60_v38 }
  0x3e   :  { %191 = vmatpush3.bf16.msra.mxu0 %v92_v25 }
  0x3f   :  { %192 = vmatprep.subr.bf16.mxu0 %v93_v34 }
  0x42   :  { %193 = vmatpush3.bf16.msra.mxu0 %v93_v34 }
  0x43   :  { %194 = vmatprep.subr.bf16.mxu0 %v94_v39  ;;  %v214_v40 = vpop.eup %213 }
  0x44   :  { %v216_v41 = vpop.eup %215 }
  0x45   :  { %v218_v42 = vpop.eup %217  ;;  %v69_v43 = vpack.c.bf16 %v216_v41, %v214_v40 }
  0x46   :  { %195 = vmatpush3.bf16.msra.mxu0 %v94_v39  ;;  %v220_v44 = vpop.eup %219 }
  0x47   :  { %196 = vmatprep.mubr.bf16.mxu0 %v69_v43  ;;  %v70_v45 = vpack.c.bf16 %v220_v44, %v218_v42 }
  0x49   :  { %197 = vmatmul.mubr.bf16.vlgmr.msra.gmra.mrb[0].mxu0 %v70_v45 }
 0x11c   :  { %v198_v46 = vpop.f32.mrb[0].mxu0 }
 0x11d   :  { %146 = vst [vmem:[#allocation7 + $0x10] sm:$0xff] %v198_v46  ;;  %v129_v47 = vpop.f32.mrb[1].mxu0 }
 0x11e   :  { %144 = vst [vmem:[#allocation7] sm:$0xff] %v129_v47  ;;  %v199_v48 = vpop.f32.mrb[2].mxu0 }
 0x11f   :  { %147 = vst [vmem:[#allocation7 + $0x18] sm:$0xff] %v199_v48  ;;  %v132_v49 = vpop.f32.mrb[3].mxu0 }
 0x120   :  { %145 = vst [vmem:[#allocation7 + $0x8] sm:$0xff] %v132_v49 }
 0x121   :  { %276 = shalt.err (!%p273_p6)
}
 0x122   :  { %s277_s10 = scalar_lea.hbm %s360_s2, 512 }
 0x123   :  { %p278_p7 = scmp.ne.s32.totalorder %s360_s2, %s277_s10  ;;  %p281_p8 = scmp.lt.u32.totalorder %s277_s10, %s360_s2 }
 0x125   :  { %p283_p9 = pnand %p281_p8, %p278_p7 }
 0x127   :  { %286 = shalt.err (!%p283_p9)
}
 0x128   :  { %159 = dma.vmem_to_hbm [thread:$0]  %s154_s6, 512, %s360_s2, [#allocation4], %s294_s19, %s294_s19, %s295_s20  }
 0x129   :  { %291 = dma.done.wait [#allocation4], 512  }
 0x12a   :  { %292 = vsyncadd [#allocation4], 4294966784 }
 0x12b   :  { %163 = vsyncpa [#allocation3], 1 }
 0x12c   :  { %164 = vsyncpa [#allocation6], 1 }
 0x12d   :  { %165 = vsyncpa [#allocation4], 1 }

</bundles_post_ra>
